<compile_context>
chip_gen: v5e
topology: v5e:2x2
jax: 0.10.0
libtpu: 0.0.40
codegen_flags: <defaults>
</compile_context>

<pallas_src>
import functools

import jax
import jax.numpy as jnp
from jax.experimental import pallas as pl
from jax.experimental.pallas import tpu as pltpu


def _round_up(x, m):
    return ((x + m - 1) // m) * m


def _mlp_kernel(num_layers, x_ref, *refs):
    """Fused MLP forward on one batch tile.

    refs = (w0, b0, w1, b1, ..., w_out, b_out, o_ref).
    Weights are bf16 (MXU fast path), biases f32. Matmuls accumulate in f32;
    elementwise math (bias add, ReLU, sigmoid) stays in f32; h is carried in
    bf16 between layers; output is stored as bf16 (lane-dense 128-wide slab).
    """
    o_ref = refs[-1]
    params = refs[:-1]

    h = x_ref[...]  # bf16 tile
    # Hidden layers: Linear + ReLU (dropout == identity in eval mode).
    for li in range(num_layers - 1):
        w = params[2 * li][...]
        b = params[2 * li + 1][...].astype(jnp.float32)
        a = jnp.dot(h, w, preferred_element_type=jnp.float32) + b
        a = jnp.maximum(a, 0.0)
        h = a.astype(jnp.bfloat16)

    # Output layer: Linear + Sigmoid (into a lane-dense, 128-wide padded slab).
    w = params[2 * (num_layers - 1)][...]
    b = params[2 * (num_layers - 1) + 1][...].astype(jnp.float32)
    logits = jnp.dot(h, w, preferred_element_type=jnp.float32) + b
    o_ref[...] = jax.nn.sigmoid(logits).astype(o_ref.dtype)


def mlp_forward(x, weights, biases, *, batch_tile=2048):
    """x: [B, F] float32; weights[i]: [in_i, out_i]; biases[i]: [1, out_i].

    Returns [B, no_labels] float32 (computed with bf16 operands / f32 accumulation).
    """
    B, F = x.shape
    num_layers = len(weights)
    no_labels = weights[-1].shape[1]

    # ---- batch tiling ---------------------------------------------------------
    # Multiple of 16 (bf16 packs 16 rows per sublane group); as large as batch_tile,
    # but clamped so big batches keep >= ~4 grid steps for v7x's two TensorCores.
    TB = min(batch_tile, _round_up(max(B, 16), 16))
    if B >= 64:
        TB = min(TB, max(16, _round_up(-(-B // 4), 16)))
    B_pad = _round_up(B, TB)              # remainder handling via zero-padding
    grid = (B_pad // TB,)

    # ---- lane-dense output slab (>= 128 lanes, multiple of 128) ----------------
    OUT_PAD = _round_up(max(no_labels, 128), 128)

    # ---- wrapper-side casts/pads so DMA'd bytes are already bf16 ---------------
    x_p = x
    if B_pad != B:
        x_p = jnp.pad(x_p, ((0, B_pad - B), (0, 0)))
    x_p = x_p.astype(jnp.bfloat16)

    w_args, b_args = [], []
    for li, (w, b) in enumerate(zip(weights, biases)):
        if li == num_layers - 1 and OUT_PAD != w.shape[1]:
            w = jnp.pad(w, ((0, 0), (0, OUT_PAD - w.shape[1])))
            b = jnp.pad(b, ((0, 0), (0, OUT_PAD - b.shape[1])))
        w_args.append(w.astype(jnp.bfloat16))
        b_args.append(b.astype(jnp.float32))

    in_specs = [pl.BlockSpec((TB, F), lambda i: (i, 0))]
    args = [x_p]
    for w, b in zip(w_args, b_args):
        # Constant index_map keeps params resident across all grid steps; they are
        # never re-fetched, so a single buffer is enough (halves their VMEM).
        in_specs.append(
            pl.BlockSpec(w.shape, lambda i: (0, 0), pipeline_mode=pl.Buffered(1)))
        in_specs.append(
            pl.BlockSpec(b.shape, lambda i: (0, 0), pipeline_mode=pl.Buffered(1)))
        args.append(w)
        args.append(b)

    out_spec = pl.BlockSpec((TB, OUT_PAD), lambda i: (i, 0))

    kernel = functools.partial(_mlp_kernel, num_layers)

    # ---- advisory cost hint so XLA schedules the custom call sensibly ----------
    dims = [F] + [w.shape[1] for w in weights]
    flops = 2 * B_pad * sum(di * do for di, do in zip(dims[:-1], dims[1:]))
    bytes_accessed = (
        x_p.size * x_p.dtype.itemsize
        + sum(int(a.size) * a.dtype.itemsize for a in (w_args + b_args))
        + B_pad * OUT_PAD * 2  # bf16 output slab
    )
    cost = pl.CostEstimate(
        flops=int(flops),
        transcendentals=int(B_pad * OUT_PAD),  # sigmoid -> exp
        bytes_accessed=int(bytes_accessed),
    )

    # ---- VMEM limit from the actual footprint (not a hardcoded number) ---------
    x_tile_bytes = TB * F * 2                   # bf16, double-buffered
    out_tile_bytes = TB * OUT_PAD * 2           # bf16, double-buffered
    param_bytes = (sum(int(w.size) * 2 for w in w_args)
                   + sum(int(b.size) * 4 for b in b_args))
    vmem_need = 2 * x_tile_bytes + 2 * out_tile_bytes + param_bytes
    vmem_limit = int(min(max(2 * vmem_need, 16 * 1024 * 1024), 48 * 1024 * 1024))

    out_padded = pl.pallas_call(
        kernel,
        out_shape=jax.ShapeDtypeStruct((B_pad, OUT_PAD), jnp.bfloat16),
        grid_spec=pltpu.PrefetchScalarGridSpec(
            num_scalar_prefetch=0,
            grid=grid,
            in_specs=in_specs,
            out_specs=out_spec,
        ),
        compiler_params=pltpu.CompilerParams(
            dimension_semantics=("parallel",),
            vmem_limit_bytes=vmem_limit,
        ),
        cost_estimate=cost,
    )(*args)

    # Padded rows/columns are sliced off here; never consume out_padded directly.
    return out_padded[:B, :no_labels].astype(jnp.float32)


def init_mlp_params(key, no_features, no_hidden, no_labels,
                    no_hidden_neurons=(128, 128, 128)):
    """Deterministic init mimicking nn.Linear's U(-1/sqrt(fan_in), 1/sqrt(fan_in))."""
    assert len(no_hidden_neurons) == no_hidden
    dims = [no_features] + list(no_hidden_neurons) + [no_labels]
    weights, biases = [], []
    for i in range(len(dims) - 1):
        fan_in, fan_out = dims[i], dims[i + 1]
        key, kw, kb = jax.random.split(key, 3)
        bound = 1.0 / jnp.sqrt(jnp.float32(fan_in))
        w = jax.random.uniform(kw, (fan_in, fan_out), jnp.float32, -bound, bound)
        b = jax.random.uniform(kb, (1, fan_out), jnp.float32, -bound, bound)
        weights.append(w)
        biases.append(b)
    return weights, biases


if __name__ == "__main__":
    key = jax.random.PRNGKey(0)

    B = 8            # batch
    no_features = 32
    no_hidden = 3
    no_labels = 4
    no_hidden_neurons = (128, 128, 128)

    key, kx = jax.random.split(key)
    x = jax.random.normal(kx, (B, no_features), jnp.float32)

    weights, biases = init_mlp_params(
        key, no_features, no_hidden, no_labels, no_hidden_neurons)

    out = mlp_forward(x, weights, biases)
    out = jax.block_until_ready(out)
    assert out.shape == (B, no_labels)

    # Reference 1: mirrors the kernel's bf16-operand / f32-accumulate arithmetic
    # (eval-mode dropout == identity), including the bf16 output store.
    h = x.astype(jnp.bfloat16)
    for w, b in zip(weights[:-1], biases[:-1]):
        a = jnp.dot(h, w.astype(jnp.bfloat16),
                    preferred_element_type=jnp.float32) + b
        h = jnp.maximum(a, 0.0).astype(jnp.bfloat16)
    ref_bf16 = jax.nn.sigmoid(
        jnp.dot(h, weights[-1].astype(jnp.bfloat16),
                preferred_element_type=jnp.float32) + biases[-1]
    ).astype(jnp.bfloat16).astype(jnp.float32)
    assert jnp.allclose(out, ref_bf16, atol=2e-3), "mismatch vs bf16-matched reference"

    # Reference 2: full-f32 math (PyTorch-parity check, loose tolerance because the
    # kernel intentionally uses bf16 operands / bf16 output store).
    h32 = x
    for w, b in zip(weights[:-1], biases[:-1]):
        h32 = jnp.maximum(jnp.dot(h32, w) + b, 0.0)
    ref_f32 = jax.nn.sigmoid(jnp.dot(h32, weights[-1]) + biases[-1])
    assert jnp.allclose(out, ref_f32, atol=5e-2), "mismatch vs f32 reference"

    print("KERNEL_OK")
</pallas_src>

<mosaic_0001>
module attributes {stable_mosaic.version = 11 : i64} {
  func.func @_mlp_kernel(%arg0: i32, %arg1: memref<16x32xbf16, #tpu.memory_space<vmem>>, %arg2: memref<32x128xbf16, #tpu.memory_space<vmem>>, %arg3: memref<1x128xf32, #tpu.memory_space<vmem>>, %arg4: memref<128x128xbf16, #tpu.memory_space<vmem>>, %arg5: memref<1x128xf32, #tpu.memory_space<vmem>>, %arg6: memref<128x128xbf16, #tpu.memory_space<vmem>>, %arg7: memref<1x128xf32, #tpu.memory_space<vmem>>, %arg8: memref<128x128xbf16, #tpu.memory_space<vmem>>, %arg9: memref<1x128xf32, #tpu.memory_space<vmem>>, %arg10: memref<16x128xbf16, #tpu.memory_space<vmem>>) attributes {dimension_semantics = [#tpu.dimension_semantics<parallel>], iteration_bounds = array<i64: 1>, scalar_prefetch = 0 : i64, scratch_operands = 0 : i64, tpu.core_type = #tpu.core_type<tc>, window_params = [{transform_indices = @transform_0, window_bounds = array<i64: 16, 32>}, {pipeline_mode = #tpu.pipeline_mode<synchronous>, transform_indices = @transform_1, window_bounds = array<i64: 32, 128>}, {pipeline_mode = #tpu.pipeline_mode<synchronous>, transform_indices = @transform_2, window_bounds = array<i64: 1, 128>}, {pipeline_mode = #tpu.pipeline_mode<synchronous>, transform_indices = @transform_3, window_bounds = array<i64: 128, 128>}, {pipeline_mode = #tpu.pipeline_mode<synchronous>, transform_indices = @transform_4, window_bounds = array<i64: 1, 128>}, {pipeline_mode = #tpu.pipeline_mode<synchronous>, transform_indices = @transform_5, window_bounds = array<i64: 128, 128>}, {pipeline_mode = #tpu.pipeline_mode<synchronous>, transform_indices = @transform_6, window_bounds = array<i64: 1, 128>}, {pipeline_mode = #tpu.pipeline_mode<synchronous>, transform_indices = @transform_7, window_bounds = array<i64: 128, 128>}, {pipeline_mode = #tpu.pipeline_mode<synchronous>, transform_indices = @transform_8, window_bounds = array<i64: 1, 128>}, {transform_indices = @transform_9, window_bounds = array<i64: 16, 128>}]} {
    %c0 = arith.constant 0 : index
    %c0_0 = arith.constant 0 : index
    %0 = vector.load %arg1[%c0, %c0_0] : memref<16x32xbf16, #tpu.memory_space<vmem>>, vector<16x32xbf16>
    %c0_1 = arith.constant 0 : index
    %c0_2 = arith.constant 0 : index
    %1 = vector.load %arg2[%c0_1, %c0_2] : memref<32x128xbf16, #tpu.memory_space<vmem>>, vector<32x128xbf16>
    %c0_3 = arith.constant 0 : index
    %c0_4 = arith.constant 0 : index
    %2 = vector.load %arg3[%c0_3, %c0_4] : memref<1x128xf32, #tpu.memory_space<vmem>>, vector<1x128xf32>
    %cst = arith.constant dense<0.000000e+00> : vector<16x128xf32>
    %3 = tpu.matmul %0, %1, %cst {dimension_numbers = #tpu.dot_dimension_numbers<[1], [0], [0], [1], [0, 0, 1, 1], [], []>} : vector<16x32xbf16>, vector<32x128xbf16>, vector<16x128xf32> -> vector<16x128xf32>
    %4 = vector.broadcast %2 : vector<1x128xf32> to vector<16x128xf32>
    %5 = arith.addf %3, %4 : vector<16x128xf32>
    %cst_5 = arith.constant 0.000000e+00 : f32
    %6 = vector.broadcast %cst_5 : f32 to vector<16x128xf32>
    %7 = arith.maximumf %5, %6 : vector<16x128xf32>
    %8 = arith.truncf %7 : vector<16x128xf32> to vector<16x128xbf16>
    %c0_6 = arith.constant 0 : index
    %c0_7 = arith.constant 0 : index
    %9 = vector.load %arg4[%c0_6, %c0_7] : memref<128x128xbf16, #tpu.memory_space<vmem>>, vector<128x128xbf16>
    %c0_8 = arith.constant 0 : index
    %c0_9 = arith.constant 0 : index
    %10 = vector.load %arg5[%c0_8, %c0_9] : memref<1x128xf32, #tpu.memory_space<vmem>>, vector<1x128xf32>
    %cst_10 = arith.constant dense<0.000000e+00> : vector<16x128xf32>
    %11 = tpu.matmul %8, %9, %cst_10 {dimension_numbers = #tpu.dot_dimension_numbers<[1], [0], [0], [1], [0, 0, 1, 1], [], []>} : vector<16x128xbf16>, vector<128x128xbf16>, vector<16x128xf32> -> vector<16x128xf32>
    %12 = vector.broadcast %10 : vector<1x128xf32> to vector<16x128xf32>
    %13 = arith.addf %11, %12 : vector<16x128xf32>
    %cst_11 = arith.constant 0.000000e+00 : f32
    %14 = vector.broadcast %cst_11 : f32 to vector<16x128xf32>
    %15 = arith.maximumf %13, %14 : vector<16x128xf32>
    %16 = arith.truncf %15 : vector<16x128xf32> to vector<16x128xbf16>
    %c0_12 = arith.constant 0 : index
    %c0_13 = arith.constant 0 : index
    %17 = vector.load %arg6[%c0_12, %c0_13] : memref<128x128xbf16, #tpu.memory_space<vmem>>, vector<128x128xbf16>
    %c0_14 = arith.constant 0 : index
    %c0_15 = arith.constant 0 : index
    %18 = vector.load %arg7[%c0_14, %c0_15] : memref<1x128xf32, #tpu.memory_space<vmem>>, vector<1x128xf32>
    %cst_16 = arith.constant dense<0.000000e+00> : vector<16x128xf32>
    %19 = tpu.matmul %16, %17, %cst_16 {dimension_numbers = #tpu.dot_dimension_numbers<[1], [0], [0], [1], [0, 0, 1, 1], [], []>} : vector<16x128xbf16>, vector<128x128xbf16>, vector<16x128xf32> -> vector<16x128xf32>
    %20 = vector.broadcast %18 : vector<1x128xf32> to vector<16x128xf32>
    %21 = arith.addf %19, %20 : vector<16x128xf32>
    %cst_17 = arith.constant 0.000000e+00 : f32
    %22 = vector.broadcast %cst_17 : f32 to vector<16x128xf32>
    %23 = arith.maximumf %21, %22 : vector<16x128xf32>
    %24 = arith.truncf %23 : vector<16x128xf32> to vector<16x128xbf16>
    %c0_18 = arith.constant 0 : index
    %c0_19 = arith.constant 0 : index
    %25 = vector.load %arg8[%c0_18, %c0_19] : memref<128x128xbf16, #tpu.memory_space<vmem>>, vector<128x128xbf16>
    %c0_20 = arith.constant 0 : index
    %c0_21 = arith.constant 0 : index
    %26 = vector.load %arg9[%c0_20, %c0_21] : memref<1x128xf32, #tpu.memory_space<vmem>>, vector<1x128xf32>
    %cst_22 = arith.constant dense<0.000000e+00> : vector<16x128xf32>
    %27 = tpu.matmul %24, %25, %cst_22 {dimension_numbers = #tpu.dot_dimension_numbers<[1], [0], [0], [1], [0, 0, 1, 1], [], []>} : vector<16x128xbf16>, vector<128x128xbf16>, vector<16x128xf32> -> vector<16x128xf32>
    %28 = vector.broadcast %26 : vector<1x128xf32> to vector<16x128xf32>
    %29 = arith.addf %27, %28 : vector<16x128xf32>
    %30 = arith.negf %29 : vector<16x128xf32>
    %31 = math.exp %30 : vector<16x128xf32>
    %cst_23 = arith.constant 1.000000e+00 : f32
    %32 = vector.broadcast %cst_23 : f32 to vector<16x128xf32>
    %33 = arith.addf %32, %31 : vector<16x128xf32>
    %34 = arith.divf %32, %33 : vector<16x128xf32>
    %35 = arith.truncf %34 : vector<16x128xf32> to vector<16x128xbf16>
    %c0_24 = arith.constant 0 : index
    %c0_25 = arith.constant 0 : index
    %36 = vector.load %arg10[%c0_24, %c0_25] : memref<16x128xbf16, #tpu.memory_space<vmem>>, vector<16x128xbf16>
    tpu.vector_store %arg10[%c0_24, %c0_25], %35 {strides = array<i32>} : memref<16x128xbf16, #tpu.memory_space<vmem>>, vector<16x128xbf16>,
    return
  }
  func.func @transform_0(%arg0: i32) -> (i32, i32) {
    %c0_i32 = arith.constant 0 : i32
    %c0_i32_0 = arith.constant 0 : i32
    return %arg0, %c0_i32 : i32, i32
  }
  func.func @transform_1(%arg0: i32) -> (i32, i32) {
    %c0_i32 = arith.constant 0 : i32
    %c0_i32_0 = arith.constant 0 : i32
    %c0_i32_1 = arith.constant 0 : i32
    return %c0_i32, %c0_i32_0 : i32, i32
  }
  func.func @transform_2(%arg0: i32) -> (i32, i32) {
    %c0_i32 = arith.constant 0 : i32
    %c0_i32_0 = arith.constant 0 : i32
    %c0_i32_1 = arith.constant 0 : i32
    return %c0_i32, %c0_i32_0 : i32, i32
  }
  func.func @transform_3(%arg0: i32) -> (i32, i32) {
    %c0_i32 = arith.constant 0 : i32
    %c0_i32_0 = arith.constant 0 : i32
    %c0_i32_1 = arith.constant 0 : i32
    return %c0_i32, %c0_i32_0 : i32, i32
  }
  func.func @transform_4(%arg0: i32) -> (i32, i32) {
    %c0_i32 = arith.constant 0 : i32
    %c0_i32_0 = arith.constant 0 : i32
    %c0_i32_1 = arith.constant 0 : i32
    return %c0_i32, %c0_i32_0 : i32, i32
  }
  func.func @transform_5(%arg0: i32) -> (i32, i32) {
    %c0_i32 = arith.constant 0 : i32
    %c0_i32_0 = arith.constant 0 : i32
    %c0_i32_1 = arith.constant 0 : i32
    return %c0_i32, %c0_i32_0 : i32, i32
  }
  func.func @transform_6(%arg0: i32) -> (i32, i32) {
    %c0_i32 = arith.constant 0 : i32
    %c0_i32_0 = arith.constant 0 : i32
    %c0_i32_1 = arith.constant 0 : i32
    return %c0_i32, %c0_i32_0 : i32, i32
  }
  func.func @transform_7(%arg0: i32) -> (i32, i32) {
    %c0_i32 = arith.constant 0 : i32
    %c0_i32_0 = arith.constant 0 : i32
    %c0_i32_1 = arith.constant 0 : i32
    return %c0_i32, %c0_i32_0 : i32, i32
  }
  func.func @transform_8(%arg0: i32) -> (i32, i32) {
    %c0_i32 = arith.constant 0 : i32
    %c0_i32_0 = arith.constant 0 : i32
    %c0_i32_1 = arith.constant 0 : i32
    return %c0_i32, %c0_i32_0 : i32, i32
  }
  func.func @transform_9(%arg0: i32) -> (i32, i32) {
    %c0_i32 = arith.constant 0 : i32
    %c0_i32_0 = arith.constant 0 : i32
    return %arg0, %c0_i32 : i32, i32
  }
}

</mosaic_0001>

<bundles_post_ra>
// kernel: tpu_custom_call.1
= control target key start
LH: loop header
LB: loop body
LE: loop exit
PB: predicated region body
PF: predicated region fallthrough
CT: control target
= control target key end

     0   :  { %14 = vsyncpa [#allocation3], 0  ;;  %s896_s0 = inlined_call_operand.hbm [shape: bf16[16,32], index: 0, kind: input, shape index: {}]   ;;  %s897_s1 = inlined_call_operand.hbm [shape: bf16[32,128], index: 1, kind: input, shape index: {}]   ;;  %s898_s2 = inlined_call_operand.vmem [shape: f32[1,128], index: 2, kind: input, shape index: {}]   ;;  %s899_s3 = inlined_call_operand.hbm [shape: bf16[128,128], index: 3, kind: input, shape index: {}]   ;;  %s900_s4 = inlined_call_operand.vmem [shape: f32[1,128], index: 4, kind: input, shape index: {}]   ;;  %s901_s5 = inlined_call_operand.hbm [shape: bf16[128,128], index: 5, kind: input, shape index: {}]   ;;  %s902_s6 = inlined_call_operand.vmem [shape: f32[1,128], index: 6, kind: input, shape index: {}]   ;;  %s903_s7 = inlined_call_operand.hbm [shape: bf16[128,128], index: 7, kind: input, shape index: {}]   ;;  %s904_s8 = inlined_call_operand.vmem [shape: f32[1,128], index: 8, kind: input, shape index: {}]   ;;  %s905_s9 = inlined_call_operand.hbm [shape: bf16[16,128], index: 9, kind: output, shape index: {}]  }
   0x1   :  { %15 = vsyncpa [#allocation6], 0 }
   0x2   :  { %16 = vsyncpa [#allocation9], 0 }
   0x3   :  { %17 = vsyncpa [#allocation4], 0  ;;  %s35_s11 = sshll.u32 %s897_s1, 4  ;;  %s790_s12 = smov [#allocation5]   ;;  %s36_s11 = int_to_ptr.hbm [resolvable:$true] %s35_s11 }
   0x4   :  { %s37_s13 = sshll.u32 %s790_s12, 4  ;;  %s65_s16 = sshll.u32 %s901_s5, 4  ;;  %s38_s13 = int_to_ptr.vmem [resolvable:$true] %s37_s13  ;;  %s66_s16 = int_to_ptr.hbm [resolvable:$true] %s65_s16 }
   0x5   :  { %s791_s17 = smov 64   ;;  %s792_s18 = smov 4  }
   0x6   :  { %43 = dma.hbm_to_vmem [thread:$0]  %s36_s11, 256, %s38_s13, [#allocation6], %s791_s17, %s791_s17, %s792_s18  }
   0x7   :  { %s793_s19 = smov [#allocation8]   ;;  %s22_s1 = sshll.u32 %s896_s0, 4  ;;  %s23_s1 = int_to_ptr.hbm [resolvable:$true] %s22_s1 }
   0x8   :  { %s67_s20 = sshll.u32 %s793_s19, 4  ;;  %s50_s24 = sshll.u32 %s899_s3, 4  ;;  %s68_s20 = int_to_ptr.vmem [resolvable:$true] %s67_s20  ;;  %s51_s24 = int_to_ptr.hbm [resolvable:$true] %s50_s24 }
   0x9   :  { %73 = dma.hbm_to_vmem [thread:$0]  %s66_s16, 1024, %s68_s20, [#allocation9], %s791_s17, %s791_s17, %s792_s18  }
   0xa   :  { %s794_s25 = smov [#allocation2]   ;;  %s795_s27 = smov [#allocation7]  }
   0xb   :  { %s24_s26 = sshll.u32 %s794_s25, 4  ;;  %s52_s0 = sshll.u32 %s795_s27, 4  ;;  %s25_s26 = int_to_ptr.vmem [resolvable:$true] %s24_s26  ;;  %s53_s0 = int_to_ptr.vmem [resolvable:$true] %s52_s0 }
   0xc   :  { %30 = dma.hbm_to_vmem [thread:$0]  %s23_s1, 128, %s25_s26, [#allocation3], %s791_s17, %s791_s17, %s792_s18  }
   0xd   :  { %s80_s30 = sshll.u32 %s903_s7, 4  ;;  %s796_s3 = smov [#allocation10]   ;;  %s81_s30 = int_to_ptr.hbm [resolvable:$true] %s80_s30 }
   0xe   :  { %58 = dma.hbm_to_vmem [thread:$0]  %s51_s24, 1024, %s53_s0, [#allocation6], %s791_s17, %s791_s17, %s792_s18  }
   0xf   :  { %s82_s10 = sshll.u32 %s796_s3, 4  ;;  %s83_s10 = int_to_ptr.vmem [resolvable:$true] %s82_s10 }
  0x10   :  { %88 = dma.hbm_to_vmem [thread:$0]  %s81_s30, 1024, %s83_s10, [#allocation9], %s791_s17, %s791_s17, %s792_s18  }
  0x11   :  { %782 = dma.done.wait [#allocation3], 128  }
  0x12   :  { %783 = vsyncadd [#allocation3], 4294967168 }
  0x13   :  { %784 = dma.done.wait [#allocation6], 1280  }
  0x14   :  { %785 = vsyncadd [#allocation6], 4294966016 }
  0x15   :  { %786 = dma.done.wait [#allocation9], 2048  }
  0x16   :  { %787 = vsyncadd [#allocation9], 4294965248  ;;  %v588_v0 = vld [vmem:[#allocation5 + $0x8] sm:$0xff]  ;;  %v587_v2 = vld [vmem:[#allocation5] sm:$0xff]  ;;  %vm139_vm0 = vcmask 261120   ;;  %s460_s20 = sshll.u32 %s905_s9, 4  ;;  %s461_s20 = int_to_ptr.hbm [resolvable:$true] %s460_s20 }
  0x17   :  { %v596_v1 = vld [vmem:[#allocation7 + $0x38] sm:$0xff]  ;;  %149 = vmatpush.bf16.msra.mxu0 %v588_v0  ;;  %v595_v3 = vld [vmem:[#allocation7 + $0x30] sm:$0xff]  ;;  %v586_v4 = vld [vmem:[#allocation2] sm:$0xff] }
  0x18   :  { %228 = vmatpush.bf16.msra.mxu1 %v596_v1  ;;  %v594_v5 = vld [vmem:[#allocation7 + $0x28] sm:$0xff]  ;;  %v593_v6 = vld [vmem:[#allocation7 + $0x20] sm:$0xff]  ;;  %v592_v7 = vld [vmem:[#allocation7 + $0x18] sm:$0xff] }
  0x19   :  { %v591_v8 = vld [vmem:[#allocation7 + $0x10] sm:$0xff]  ;;  %v590_v9 = vld [vmem:[#allocation7 + $0x8] sm:$0xff]  ;;  %v589_v10 = vld [vmem:[#allocation7] sm:$0xff] }
  0x1a   :  { %v604_v11 = vld [vmem:[#allocation8 + $0x38] sm:$0xff]  ;;  %v603_v12 = vld [vmem:[#allocation8 + $0x30] sm:$0xff]  ;;  %v602_v13 = vld [vmem:[#allocation8 + $0x28] sm:$0xff] }
  0x1b   :  { %150 = vmatpush.bf16.msra.mxu0 %v587_v2  ;;  %313 = vmatpush.bf16.msra.mxu2 %v604_v11  ;;  %v601_v14 = vld [vmem:[#allocation8 + $0x20] sm:$0xff]  ;;  %v626_v16 = vld [vmem:[%s898_s2] ss:$0 sm:$0xff]  ;;  %v600_v23 = vld [vmem:[#allocation8 + $0x18] sm:$0xff] }
  0x1c   :  { %229 = vmatpush.bf16.msra.mxu1 %v595_v3  ;;  %v599_v24 = vld [vmem:[#allocation8 + $0x10] sm:$0xff]  ;;  %v598_v25 = vld [vmem:[#allocation8 + $0x8] sm:$0xff]  ;;  %v597_v26 = vld [vmem:[#allocation8] sm:$0xff] }
  0x1d   :  { %v612_v27 = vld [vmem:[#allocation10 + $0x38] sm:$0xff]  ;;  %v611_v28 = vld [vmem:[#allocation10 + $0x30] sm:$0xff]  ;;  %v610_v29 = vld [vmem:[#allocation10 + $0x28] sm:$0xff] }
  0x1e   :  { %487 = vmatmul.msk.bf16.vlgmr.msra.gmra.mxu0 %vm139_vm0, %v586_v4  ;;  %398 = vmatpush.bf16.msra.mxu3 %v612_v27  ;;  %v609_v30 = vld [vmem:[#allocation10 + $0x20] sm:$0xff]  ;;  %v627_v32 = vld [vmem:[%s900_s4] ss:$0 sm:$0xff]  ;;  %v608_v39 = vld [vmem:[#allocation10 + $0x18] sm:$0xff] }
  0x1f   :  { %314 = vmatpush.bf16.msra.mxu2 %v603_v12  ;;  %v607_v40 = vld [vmem:[#allocation10 + $0x10] sm:$0xff]  ;;  %v606_v41 = vld [vmem:[#allocation10 + $0x8] sm:$0xff]  ;;  %v605_v42 = vld [vmem:[#allocation10] sm:$0xff] }
  0x20   :  { %230 = vmatpush.bf16.msra.mxu1 %v594_v5  ;;  %v628_v44 = vld [vmem:[%s902_s6] ss:$0 sm:$0xff]  ;;  %s797_s6 = smov [#allocation11]  }
  0x21   :  { %v629_v51 = vld [vmem:[%s904_s8] ss:$0 sm:$0xff]  ;;  %s458_s8 = sshll.u32 %s797_s6, 4  ;;  %s459_s8 = int_to_ptr.vmem [resolvable:$true] %s458_s8 }
  0x22   :  { %399 = vmatpush.bf16.msra.mxu3 %v611_v28 }
  0x23   :  { %315 = vmatpush.bf16.msra.mxu2 %v602_v13 }
  0x24   :  { %231 = vmatpush.bf16.msra.mxu1 %v593_v6 }
  0x26   :  { %400 = vmatpush.bf16.msra.mxu3 %v610_v29 }
  0x27   :  { %316 = vmatpush.bf16.msra.mxu2 %v601_v14 }
  0x28   :  { %232 = vmatpush.bf16.msra.mxu1 %v592_v7 }
  0x2a   :  { %401 = vmatpush.bf16.msra.mxu3 %v609_v30 }
  0x2b   :  { %317 = vmatpush.bf16.msra.mxu2 %v600_v23 }
  0x2c   :  { %233 = vmatpush.bf16.msra.mxu1 %v591_v8 }
  0x2e   :  { %402 = vmatpush.bf16.msra.mxu3 %v608_v39 }
  0x2f   :  { %318 = vmatpush.bf16.msra.mxu2 %v599_v24 }
  0x30   :  { %234 = vmatpush.bf16.msra.mxu1 %v590_v9 }
  0x32   :  { %403 = vmatpush.bf16.msra.mxu3 %v607_v40 }
  0x33   :  { %319 = vmatpush.bf16.msra.mxu2 %v598_v25 }
  0x34   :  { %235 = vmatpush.bf16.msra.mxu1 %v589_v10 }
  0x36   :  { %404 = vmatpush.bf16.msra.mxu3 %v606_v41 }
  0x37   :  { %320 = vmatpush.bf16.msra.mxu2 %v597_v26 }
  0x3a   :  { %405 = vmatpush.bf16.msra.mxu3 %v605_v42 }
  0x9b   :  { %v152_v15 = vpop.f32.mrf.mxu0 }
  0x9c   :  { %v153_v17 = vadd.f32 %v626_v16, %v152_v15 }
  0x9e   :  { %v157_v20 = vmax.f32 %v153_v17, 0.0 }
  0xa3   :  { %v154_v18 = vpop.f32.mrf.mxu0 }
  0xa4   :  { %v155_v19 = vadd.f32 %v626_v16, %v154_v18 }
  0xa6   :  { %v158_v21 = vmax.f32 %v155_v19, 0.0 }
  0xa8   :  { %v159_v22 = vpack.c.bf16 %v158_v21, %v157_v20 }
  0xaa   :  { %236 = vmatmul.bf16.vlgmr.msra.gmra.mxu1 %v159_v22 }
 0x127   :  { %v237_v31 = vpop.f32.mrf.mxu1 }
 0x128   :  { %v238_v33 = vadd.f32 %v627_v32, %v237_v31 }
 0x12a   :  { %v242_v36 = vmax.f32 %v238_v33, 0.0 }
 0x12f   :  { %v239_v34 = vpop.f32.mrf.mxu1 }
 0x130   :  { %v240_v35 = vadd.f32 %v627_v32, %v239_v34 }
 0x132   :  { %v243_v37 = vmax.f32 %v240_v35, 0.0 }
 0x134   :  { %v244_v38 = vpack.c.bf16 %v243_v37, %v242_v36 }
 0x136   :  { %321 = vmatmul.bf16.vlgmr.msra.gmra.mxu2 %v244_v38 }
 0x1b9   :  { %v322_v43 = vpop.f32.mrf.mxu2 }
 0x1ba   :  { %v323_v45 = vadd.f32 %v628_v44, %v322_v43 }
 0x1bc   :  { %v327_v48 = vmax.f32 %v323_v45, 0.0 }
 0x1c1   :  { %v324_v46 = vpop.f32.mrf.mxu2 }
 0x1c2   :  { %v325_v47 = vadd.f32 %v628_v44, %v324_v46 }
 0x1c4   :  { %v328_v49 = vmax.f32 %v325_v47, 0.0 }
 0x1c6   :  { %v329_v50 = vpack.c.bf16 %v328_v49, %v327_v48 }
 0x1c8   :  { %406 = vmatmul.bf16.vlgmr.msra.gmra.mxu3 %v329_v50 }
 0x24b   :  { %v407_v52 = vpop.f32.mrf.mxu3 }
 0x24c   :  { %v408_v53 = vadd.f32 %v629_v51, %v407_v52 }
 0x24e   :  { %v584_v54 = vmul.f32 -1.442695, %v408_v53 }
 0x250   :  { %630 = vpow2.f32 %v584_v54 }
 0x253   :  { %v409_v55 = vpop.f32.mrf.mxu3 }
 0x254   :  { %v410_v56 = vadd.f32 %v629_v51, %v409_v55 }
 0x256   :  { %v631_v57 = vpop.eup %630  ;;  %v585_v58 = vmul.f32 -1.442695, %v410_v56 }
 0x257   :  { %v418_v59 = vadd.f32 1.0, %v631_v57 }
 0x258   :  { %632 = vpow2.f32 %v585_v58 }
 0x259   :  { %634 = vrcp.f32 %v418_v59  ;;  %vm425_vm2 = vweird.f32 %v418_v59  ;;  %v431_v6 = vand.u32 2147483648, %v418_v59  ;;  %v429_v8 = vand.u32 2147483647, %v418_v59 }
 0x25b   :  { %v432_v13 = vor.u32 1.1754944e-38, %v431_v6  ;;  %vm430_vm7 = vcmp.eq.f32.partialorder %v429_v8, 8.507059e+37 }
 0x25e   :  { %v633_v60 = vpop.eup %632 }
 0x25f   :  { %v635_v61 = vpop.eup %634  ;;  %v419_v62 = vadd.f32 1.0, %v633_v60 }
 0x260   :  { %v421_v63 = vmul.f32 %v635_v61, %v418_v59  ;;  %vm426_vm1 = vweird.f32 %v635_v61 }
 0x261   :  { %636 = vrcp.f32 %v419_v62  ;;  %v446_v7 = vand.u32 2147483648, %v419_v62  ;;  %v444_v10 = vand.u32 2147483647, %v419_v62  ;;  %vm427_vm4 = vmor %vm425_vm2, %vm426_vm1  ;;  %vm440_vm5 = vweird.f32 %v419_v62 }
 0x262   :  { %v422_v0 = vsub.f32 1.0, %v421_v63 }
 0x263   :  { %v447_v14 = vor.u32 1.1754944e-38, %v446_v7  ;;  %vm445_vm8 = vcmp.eq.f32.partialorder %v444_v10, 8.507059e+37 }
 0x264   :  { %v423_v1 = vmul.f32 %v635_v61, %v422_v0 }
 0x266   :  { %v424_v5 = vadd.f32 %v635_v61, %v423_v1 }
 0x267   :  { %v637_v2 = vpop.eup %636 }
 0x268   :  { %v436_v3 = vmul.f32 %v637_v2, %v419_v62  ;;  %vm441_vm3 = vweird.f32 %v637_v2  ;;  %v428_v11 = vsel %vm427_vm4, %v635_v61, %v424_v5 }
 0x269   :  { %vm442_vm6 = vmor %vm440_vm5, %vm441_vm3  ;;  %v433_v16 = vsel %vm430_vm7, %v432_v13, %v428_v11 }
 0x26a   :  { %v437_v4 = vsub.f32 1.0, %v436_v3 }
 0x26c   :  { %v438_v9 = vmul.f32 %v637_v2, %v437_v4 }
 0x26e   :  { %v439_v12 = vadd.f32 %v637_v2, %v438_v9 }
 0x270   :  { %v443_v15 = vsel %vm442_vm6, %v637_v2, %v439_v12 }
 0x271   :  { %v448_v17 = vsel %vm445_vm8, %v447_v14, %v443_v15 }
 0x272   :  { %v616_v18 = vpack.c.bf16 %v448_v17, %v433_v16 }
 0x274   :  { %617 = vst [vmem:[#allocation11] sm:$0xff] %v616_v18  }
 0x275   :  { %466 = dma.vmem_to_hbm [thread:$0]  %s459_s8, 128, %s461_s20, [#allocation4], %s791_s17, %s791_s17, %s792_s18  }
 0x276   :  { %788 = dma.done.wait [#allocation4], 128  }
 0x277   :  { %789 = vsyncadd [#allocation4], 4294967168 }
 0x278   :  { %471 = vsyncpa [#allocation3], 1 }
 0x279   :  { %472 = vsyncpa [#allocation6], 1 }
 0x27a   :  { %473 = vsyncpa [#allocation9], 1 }
 0x27b   :  { %474 = vsyncpa [#allocation4], 1 }

</bundles_post_ra>
